<compile_context>
chip_gen: v6e
topology: v6e:2x2x1
jax: 0.10.0
libtpu: 0.0.40
codegen_flags: <defaults>
</compile_context>

<pallas_src>
import functools

import jax
import jax.numpy as jnp
from jax.experimental import pallas as pl
from jax.experimental.pallas import tpu as pltpu


def _posterior_encoder_kernel(
    # scalar prefetch (SMEM)
    lens_ref, dil_ref, pad_ref,
    # inputs (VMEM)
    x_ref, noise_ref,
    pre_w_ref, pre_b_ref,
    in_w_ref, in_b_ref,
    rs_w_ref, rs_b_ref,
    proj_w_ref, proj_b_ref,
    # outputs (VMEM)
    out_ref,
    # scratch (VMEM, persistent across the layer grid axis)
    hpad_ref, skip_ref,
    *, hidden_channels, out_channels, kernel_size, center):
  b = pl.program_id(0)
  i = pl.program_id(1)                      # layer index (grid "arbitrary" axis)
  n_layers = pl.num_programs(1)
  T = x_ref.shape[1]
  H = hidden_channels
  C = center                                # sublane-aligned center row offset

  # sequence_mask(x_lengths, T) -> (T, 1) float mask for this batch element.
  t_idx = jax.lax.broadcasted_iota(jnp.int32, (T, 1), 0)
  mask = (t_idx < lens_ref[b]).astype(jnp.float32)

  # ---- layer 0: init scratches + self.pre (1x1 conv == per-step matmul) ----
  @pl.when(i == 0)
  def _init():
    hpad_ref[...] = jnp.zeros_like(hpad_ref)      # zero pads once per batch el.
    skip_ref[...] = jnp.zeros_like(skip_ref)
    h0 = (jnp.dot(x_ref[0], pre_w_ref[...],
                  preferred_element_type=jnp.float32)
          + pre_b_ref[...]) * mask                # (T, H)
    hpad_ref[C:C + T, :] = h0

  # ---- WN layer i (weights for this layer only are resident/streamed) ----
  dil = dil_ref[i]
  pad = pad_ref[i]
  # im2col: K shifted (T, H) views of the zero-padded h, fused into a single
  # matmul with contraction depth K*H.
  taps = [hpad_ref[pl.ds(C - pad + k * dil, T), :]
          for k in range(kernel_size)]
  col = jnp.concatenate(taps, axis=-1)            # (T, K*H)
  x_in = (jnp.dot(col, in_w_ref[0], preferred_element_type=jnp.float32)
          + in_b_ref[0])                          # (T, 2H)

  # fused_add_tanh_sigmoid_multiply (g contribution is zero, p_dropout == 0).
  acts = jnp.tanh(x_in[:, :H]) * jax.nn.sigmoid(x_in[:, H:])   # (T, H)

  # res_skip 1x1 conv (last layer's res half is zero in the params).
  rs = (jnp.dot(acts, rs_w_ref[0], preferred_element_type=jnp.float32)
        + rs_b_ref[0])                            # (T, 2H)
  hpad_ref[C:C + T, :] = (hpad_ref[C:C + T, :] + rs[:, :H]) * mask  # residual
  skip_ref[...] = skip_ref[...] + rs[:, H:]                          # skip

  # ---- last layer: self.proj + reparameterized z; single lane-dense store --
  @pl.when(i == n_layers - 1)
  def _finalize():
    out = skip_ref[...] * mask                    # (T, H)
    stats = (jnp.dot(out, proj_w_ref[...],
                     preferred_element_type=jnp.float32)
             + proj_b_ref[...]) * mask            # (T, 2*Cout) == [m | logs]
    m = stats[:, :out_channels]
    logs = stats[:, out_channels:]
    z = (m + noise_ref[0] * jnp.exp(logs)) * mask
    out_ref[0] = jnp.concatenate([z, stats], axis=-1)   # [z | m | logs]


def init_params(key, in_channels, hidden_channels, out_channels,
                kernel_size, n_layers):
  """Deterministic synthetic parameters (weight_norm at init is identity)."""
  H = hidden_channels
  ks = jax.random.split(key, 8)
  s = 0.1
  pre_w = s * jax.random.normal(ks[0], (in_channels, H), jnp.float32)
  pre_b = s * jax.random.normal(ks[1], (1, H), jnp.float32)
  in_w = s * jax.random.normal(ks[2], (n_layers, kernel_size, H, 2 * H),
                               jnp.float32)
  in_b = s * jax.random.normal(ks[3], (n_layers, 2 * H), jnp.float32)
  rs_w = s * jax.random.normal(ks[4], (n_layers, H, 2 * H), jnp.float32)
  rs_b = s * jax.random.normal(ks[5], (n_layers, 2 * H), jnp.float32)
  # Last WN layer's res_skip conv only has `hidden` outputs (skip-only):
  # zero out the residual half so a uniform (H, 2H) weight can be used.
  rs_w = rs_w.at[n_layers - 1, :, :H].set(0.0)
  rs_b = rs_b.at[n_layers - 1, :H].set(0.0)
  proj_w = s * jax.random.normal(ks[6], (H, 2 * out_channels), jnp.float32)
  proj_b = s * jax.random.normal(ks[7], (1, 2 * out_channels), jnp.float32)
  return dict(pre_w=pre_w, pre_b=pre_b, in_w=in_w, in_b=in_b,
              rs_w=rs_w, rs_b=rs_b, proj_w=proj_w, proj_b=proj_b)


def posterior_encoder_forward(params, x_nct, x_lengths, noise_nct, *,
                              hidden_channels, out_channels, kernel_size,
                              dilation_rate, n_layers):
  """x_nct: (B, Cin, T) PyTorch layout; noise_nct: (B, Cout, T)."""
  B, Cin, T = x_nct.shape
  H, Cout, K = hidden_channels, out_channels, kernel_size

  x_btc = jnp.transpose(x_nct, (0, 2, 1)).astype(jnp.float32)       # (B,T,Cin)
  noise_btc = jnp.transpose(noise_nct, (0, 2, 1)).astype(jnp.float32)

  # Per-layer dilation / padding, passed via scalar prefetch (SMEM).
  dils_py = [dilation_rate ** j for j in range(n_layers)]
  pads_py = [d * (K - 1) // 2 for d in dils_py]
  max_pad = max(pads_py)
  center = ((max_pad + 7) // 8) * 8          # sublane-aligned center offset
  dils = jnp.asarray(dils_py, jnp.int32)
  pads = jnp.asarray(pads_py, jnp.int32)

  # im2col-reshaped conv weights: (L, K, H, 2H) -> (L, K*H, 2H).
  in_w_flat = params["in_w"].reshape(n_layers, K * H, 2 * H)
  in_b3 = params["in_b"][:, None, :]                                # (L,1,2H)
  rs_b3 = params["rs_b"][:, None, :]                                # (L,1,2H)

  kernel = functools.partial(
      _posterior_encoder_kernel,
      hidden_channels=H, out_channels=Cout, kernel_size=K, center=center)

  def per_batch(c):
    def imap(b, i, lens, dl, pd):
      return (b, 0, 0)
    return pl.BlockSpec((1, T, c), imap)

  def const_spec(arr):
    zeros = (0,) * arr.ndim
    def imap(b, i, lens, dl, pd):
      return zeros
    return pl.BlockSpec(arr.shape, imap)

  def per_layer(block_tail):
    tail = tuple(block_tail)
    tail_zeros = (0,) * len(tail)
    def imap(b, i, lens, dl, pd):
      return (i,) + tail_zeros
    return pl.BlockSpec((1,) + tail, imap)

  grid_spec = pltpu.PrefetchScalarGridSpec(
      num_scalar_prefetch=3,
      grid=(B, n_layers),
      in_specs=[
          per_batch(Cin),                          # x
          per_batch(Cout),                         # noise
          const_spec(params["pre_w"]),
          const_spec(params["pre_b"]),
          per_layer((K * H, 2 * H)),               # in_w  (streamed per layer)
          per_layer((1, 2 * H)),                   # in_b
          per_layer((H, 2 * H)),                   # rs_w
          per_layer((1, 2 * H)),                   # rs_b
          const_spec(params["proj_w"]),
          const_spec(params["proj_b"]),
      ],
      out_specs=per_batch(3 * Cout),               # [z | m | logs] slab
      scratch_shapes=[
          pltpu.VMEM((2 * center + T, H), jnp.float32),  # zero-padded h
          pltpu.VMEM((T, H), jnp.float32),               # skip accumulator
      ])

  out_slab = pl.pallas_call(
      kernel,
      grid_spec=grid_spec,
      out_shape=jax.ShapeDtypeStruct((B, T, 3 * Cout), jnp.float32),
      compiler_params=pltpu.CompilerParams(
          dimension_semantics=("parallel", "arbitrary")),
  )(x_lengths.astype(jnp.int32), dils, pads,
    x_btc, noise_btc,
    params["pre_w"], params["pre_b"],
    in_w_flat, in_b3,
    params["rs_w"], rs_b3,
    params["proj_w"], params["proj_b"])

  # back to PyTorch layout: z,m,logs -> (B, Cout, T); x_mask -> (B, 1, T)
  z = jnp.transpose(out_slab[..., :Cout], (0, 2, 1))
  m = jnp.transpose(out_slab[..., Cout:2 * Cout], (0, 2, 1))
  logs = jnp.transpose(out_slab[..., 2 * Cout:], (0, 2, 1))
  x_mask = (jnp.arange(T)[None, None, :] < x_lengths[:, None, None]
            ).astype(jnp.float32)
  return z, m, logs, x_mask


def reference_forward(params, x_nct, x_lengths, noise_nct, *,
                      hidden_channels, out_channels, kernel_size,
                      dilation_rate, n_layers):
  """Pure-JAX reference mirroring the PyTorch semantics (for validation)."""
  B, Cin, T = x_nct.shape
  H = hidden_channels
  x = jnp.transpose(x_nct, (0, 2, 1)).astype(jnp.float32)
  noise = jnp.transpose(noise_nct, (0, 2, 1)).astype(jnp.float32)
  mask = (jnp.arange(T)[None, :] < x_lengths[:, None]).astype(jnp.float32)
  mask = mask[:, :, None]                                          # (B,T,1)
  h = (jnp.einsum("btc,ch->bth", x, params["pre_w"])
       + params["pre_b"][None]) * mask
  output = jnp.zeros_like(h)
  for i in range(n_layers):
    dil = dilation_rate ** i
    pad = dil * (kernel_size - 1) // 2
    hp = jnp.pad(h, ((0, 0), (pad, pad), (0, 0)))
    x_in = params["in_b"][i][None, None, :]
    for k in range(kernel_size):
      x_in = x_in + jnp.einsum("bth,hj->btj", hp[:, k * dil:k * dil + T, :],
                               params["in_w"][i, k])
    acts = jnp.tanh(x_in[..., :H]) * jax.nn.sigmoid(x_in[..., H:])
    rs = jnp.einsum("bth,hj->btj", acts, params["rs_w"][i]) + params["rs_b"][i]
    h = (h + rs[..., :H]) * mask
    output = output + rs[..., H:]
  out = output * mask
  stats = (jnp.einsum("bth,hj->btj", out, params["proj_w"])
           + params["proj_b"][None]) * mask
  m = stats[..., :out_channels]
  logs = stats[..., out_channels:]
  z = (m + noise * jnp.exp(logs)) * mask
  return (jnp.transpose(z, (0, 2, 1)), jnp.transpose(m, (0, 2, 1)),
          jnp.transpose(logs, (0, 2, 1)), jnp.transpose(mask, (0, 2, 1)))


if __name__ == "__main__":
  # Small config consistent with the module: PosteriorEncoder(16, 8, 32, 5, 1, 3)
  B, Cin, T = 2, 16, 32
  H, Cout, K, DR, L = 32, 8, 5, 1, 3

  key = jax.random.PRNGKey(0)
  kx, kn, kp = jax.random.split(key, 3)
  x = jax.random.normal(kx, (B, Cin, T), jnp.float32)
  x_lengths = jnp.array([T, 20], jnp.int32)
  # torch.randn_like(m) sampled host-side (deterministic) and passed in.
  noise = jax.random.normal(kn, (B, Cout, T), jnp.float32)
  params = init_params(kp, Cin, H, Cout, K, L)

  cfg = dict(hidden_channels=H, out_channels=Cout, kernel_size=K,
             dilation_rate=DR, n_layers=L)

  outs = posterior_encoder_forward(params, x, x_lengths, noise, **cfg)
  outs = jax.block_until_ready(outs)
  z, m, logs, x_mask = outs

  assert z.shape == (B, Cout, T) and m.shape == (B, Cout, T)
  assert logs.shape == (B, Cout, T) and x_mask.shape == (B, 1, T)

  refs = reference_forward(params, x, x_lengths, noise, **cfg)
  for got, want in zip(outs, refs):
    err = float(jnp.max(jnp.abs(got - want)))
    assert err < 1e-4, f"mismatch vs reference: {err}"

  print("KERNEL_OK")
</pallas_src>

<mosaic_0001>
module attributes {stable_mosaic.version = 11 : i64} {
  func.func @_posterior_encoder_kernel(%arg0: i32, %arg1: i32, %arg2: memref<2xi32, #tpu.memory_space<smem>>, %arg3: memref<3xi32, #tpu.memory_space<smem>>, %arg4: memref<3xi32, #tpu.memory_space<smem>>, %arg5: memref<1x32x16xf32, #tpu.memory_space<vmem>>, %arg6: memref<1x32x8xf32, #tpu.memory_space<vmem>>, %arg7: memref<16x32xf32, #tpu.memory_space<vmem>>, %arg8: memref<1x32xf32, #tpu.memory_space<vmem>>, %arg9: memref<1x160x64xf32, #tpu.memory_space<vmem>>, %arg10: memref<1x1x64xf32, #tpu.memory_space<vmem>>, %arg11: memref<1x32x64xf32, #tpu.memory_space<vmem>>, %arg12: memref<1x1x64xf32, #tpu.memory_space<vmem>>, %arg13: memref<32x16xf32, #tpu.memory_space<vmem>>, %arg14: memref<1x16xf32, #tpu.memory_space<vmem>>, %arg15: memref<1x32x24xf32, #tpu.memory_space<vmem>>, %arg16: memref<48x32xf32, #tpu.memory_space<vmem>>, %arg17: memref<32x32xf32, #tpu.memory_space<vmem>>) attributes {dimension_semantics = [#tpu.dimension_semantics<parallel>, #tpu.dimension_semantics<arbitrary>], iteration_bounds = array<i64: 2, 3>, scalar_prefetch = 3 : i64, scratch_operands = 2 : i64, tpu.core_type = #tpu.core_type<tc>, window_params = [{transform_indices = @transform_0, window_bounds = array<i64: 1, 32, 16>}, {transform_indices = @transform_1, window_bounds = array<i64: 1, 32, 8>}, {pipeline_mode = #tpu.pipeline_mode<synchronous>, transform_indices = @transform_2, window_bounds = array<i64: 16, 32>}, {pipeline_mode = #tpu.pipeline_mode<synchronous>, transform_indices = @transform_3, window_bounds = array<i64: 1, 32>}, {transform_indices = @transform_4, window_bounds = array<i64: 1, 160, 64>}, {transform_indices = @transform_5, window_bounds = array<i64: 1, 1, 64>}, {transform_indices = @transform_6, window_bounds = array<i64: 1, 32, 64>}, {transform_indices = @transform_7, window_bounds = array<i64: 1, 1, 64>}, {pipeline_mode = #tpu.pipeline_mode<synchronous>, transform_indices = @transform_8, window_bounds = array<i64: 32, 16>}, {pipeline_mode = #tpu.pipeline_mode<synchronous>, transform_indices = @transform_9, window_bounds = array<i64: 1, 16>}, {transform_indices = @transform_10, window_bounds = array<i64: 1, 32, 24>}]} {
    %0 = tpu.iota {dimensions = array<i32: 0>} : vector<32x1xi32>
    %1 = arith.index_cast %arg0 : i32 to index
    %2 = memref.load %arg2[%1] : memref<2xi32, #tpu.memory_space<smem>>
    %3 = vector.broadcast %2 : i32 to vector<32x1xi32>
    %4 = arith.cmpi slt, %0, %3 : vector<32x1xi32>
    %5 = arith.extui %4 : vector<32x1xi1> to vector<32x1xi32>
    %6 = arith.sitofp %5 : vector<32x1xi32> to vector<32x1xf32>
    %c0_i32 = arith.constant 0 : i32
    %7 = arith.cmpi eq, %arg1, %c0_i32 : i32
    %8 = arith.extui %7 : i1 to i32
    %c0_i32_0 = arith.constant 0 : i32
    %9 = arith.cmpi ne, %8, %c0_i32_0 : i32
    scf.if %9 {
      %cst_33 = arith.constant 0.000000e+00 : f32
      %76 = vector.broadcast %cst_33 : f32 to vector<48x32xf32>
      %c0_34 = arith.constant 0 : index
      %c0_35 = arith.constant 0 : index
      %77 = vector.load %arg16[%c0_34, %c0_35] : memref<48x32xf32, #tpu.memory_space<vmem>>, vector<48x32xf32>
      tpu.vector_store %arg16[%c0_34, %c0_35], %76 {strides = array<i32>} : memref<48x32xf32, #tpu.memory_space<vmem>>, vector<48x32xf32>,
      %cst_36 = arith.constant 0.000000e+00 : f32
      %78 = vector.broadcast %cst_36 : f32 to vector<32x32xf32>
      %c0_37 = arith.constant 0 : index
      %c0_38 = arith.constant 0 : index
      %79 = vector.load %arg17[%c0_37, %c0_38] : memref<32x32xf32, #tpu.memory_space<vmem>>, vector<32x32xf32>
      tpu.vector_store %arg17[%c0_37, %c0_38], %78 {strides = array<i32>} : memref<32x32xf32, #tpu.memory_space<vmem>>, vector<32x32xf32>,
      %c0_39 = arith.constant 0 : index
      %c0_40 = arith.constant 0 : index
      %c0_41 = arith.constant 0 : index
      %80 = vector.load %arg5[%c0_39, %c0_40, %c0_41] : memref<1x32x16xf32, #tpu.memory_space<vmem>>, vector<1x32x16xf32>
      %81 = vector.shape_cast %80 : vector<1x32x16xf32> to vector<32x16xf32>
      %c0_42 = arith.constant 0 : index
      %c0_43 = arith.constant 0 : index
      %82 = vector.load %arg7[%c0_42, %c0_43] : memref<16x32xf32, #tpu.memory_space<vmem>>, vector<16x32xf32>
      %cst_44 = arith.constant dense<0.000000e+00> : vector<32x32xf32>
      %83 = tpu.matmul %81, %82, %cst_44 {dimension_numbers = #tpu.dot_dimension_numbers<[1], [0], [0], [1], [0, 0, 1, 1], [], []>} : vector<32x16xf32>, vector<16x32xf32>, vector<32x32xf32> -> vector<32x32xf32>
      %c0_45 = arith.constant 0 : index
      %c0_46 = arith.constant 0 : index
      %84 = vector.load %arg8[%c0_45, %c0_46] : memref<1x32xf32, #tpu.memory_space<vmem>>, vector<1x32xf32>
      %85 = vector.broadcast %84 : vector<1x32xf32> to vector<32x32xf32>
      %86 = arith.addf %83, %85 : vector<32x32xf32>
      %87 = vector.broadcast %6 : vector<32x1xf32> to vector<32x32xf32>
      %88 = arith.mulf %86, %87 : vector<32x32xf32>
      %c8_47 = arith.constant 8 : index
      %c0_48 = arith.constant 0 : index
      %89 = vector.load %arg16[%c8_47, %c0_48] : memref<48x32xf32, #tpu.memory_space<vmem>>, vector<32x32xf32>
      tpu.vector_store %arg16[%c8_47, %c0_48], %88 {strides = array<i32>} : memref<48x32xf32, #tpu.memory_space<vmem>>, vector<32x32xf32>,
    } else {
    }
    %10 = arith.index_cast %arg1 : i32 to index
    %11 = memref.load %arg3[%10] : memref<3xi32, #tpu.memory_space<smem>>
    %12 = arith.index_cast %arg1 : i32 to index
    %13 = memref.load %arg4[%12] : memref<3xi32, #tpu.memory_space<smem>>
    %c8_i32 = arith.constant 8 : i32
    %14 = arith.subi %c8_i32, %13 : i32
    %c0_i32_1 = arith.constant 0 : i32
    %15 = arith.muli %c0_i32_1, %11 : i32
    %16 = arith.addi %14, %15 : i32
    %17 = arith.index_cast %16 : i32 to index
    %c0 = arith.constant 0 : index
    %18 = vector.load %arg16[%17, %c0] : memref<48x32xf32, #tpu.memory_space<vmem>>, vector<32x32xf32>
    %c8_i32_2 = arith.constant 8 : i32
    %19 = arith.subi %c8_i32_2, %13 : i32
    %c1_i32 = arith.constant 1 : i32
    %20 = arith.muli %c1_i32, %11 : i32
    %21 = arith.addi %19, %20 : i32
    %22 = arith.index_cast %21 : i32 to index
    %c0_3 = arith.constant 0 : index
    %23 = vector.load %arg16[%22, %c0_3] : memref<48x32xf32, #tpu.memory_space<vmem>>, vector<32x32xf32>
    %c8_i32_4 = arith.constant 8 : i32
    %24 = arith.subi %c8_i32_4, %13 : i32
    %c2_i32 = arith.constant 2 : i32
    %25 = arith.muli %c2_i32, %11 : i32
    %26 = arith.addi %24, %25 : i32
    %27 = arith.index_cast %26 : i32 to index
    %c0_5 = arith.constant 0 : index
    %28 = vector.load %arg16[%27, %c0_5] : memref<48x32xf32, #tpu.memory_space<vmem>>, vector<32x32xf32>
    %c8_i32_6 = arith.constant 8 : i32
    %29 = arith.subi %c8_i32_6, %13 : i32
    %c3_i32 = arith.constant 3 : i32
    %30 = arith.muli %c3_i32, %11 : i32
    %31 = arith.addi %29, %30 : i32
    %32 = arith.index_cast %31 : i32 to index
    %c0_7 = arith.constant 0 : index
    %33 = vector.load %arg16[%32, %c0_7] : memref<48x32xf32, #tpu.memory_space<vmem>>, vector<32x32xf32>
    %c8_i32_8 = arith.constant 8 : i32
    %34 = arith.subi %c8_i32_8, %13 : i32
    %c4_i32 = arith.constant 4 : i32
    %35 = arith.muli %c4_i32, %11 : i32
    %36 = arith.addi %34, %35 : i32
    %37 = arith.index_cast %36 : i32 to index
    %c0_9 = arith.constant 0 : index
    %38 = vector.load %arg16[%37, %c0_9] : memref<48x32xf32, #tpu.memory_space<vmem>>, vector<32x32xf32>
    %39 = tpu.concatenate %18, %23, %28, %33, %38 in 1 : vector<32x32xf32>, vector<32x32xf32>, vector<32x32xf32>, vector<32x32xf32>, vector<32x32xf32> -> vector<32x160xf32>
    %c0_10 = arith.constant 0 : index
    %c0_11 = arith.constant 0 : index
    %c0_12 = arith.constant 0 : index
    %40 = vector.load %arg9[%c0_10, %c0_11, %c0_12] : memref<1x160x64xf32, #tpu.memory_space<vmem>>, vector<1x160x64xf32>
    %41 = vector.shape_cast %40 : vector<1x160x64xf32> to vector<160x64xf32>
    %cst = arith.constant dense<0.000000e+00> : vector<32x64xf32>
    %42 = tpu.matmul %39, %41, %cst {dimension_numbers = #tpu.dot_dimension_numbers<[1], [0], [0], [1], [0, 0, 1, 1], [], []>} : vector<32x160xf32>, vector<160x64xf32>, vector<32x64xf32> -> vector<32x64xf32>
    %c0_13 = arith.constant 0 : index
    %c0_14 = arith.constant 0 : index
    %c0_15 = arith.constant 0 : index
    %43 = vector.load %arg10[%c0_13, %c0_14, %c0_15] : memref<1x1x64xf32, #tpu.memory_space<vmem>>, vector<1x1x64xf32>
    %44 = vector.shape_cast %43 : vector<1x1x64xf32> to vector<1x64xf32>
    %45 = vector.broadcast %44 : vector<1x64xf32> to vector<32x64xf32>
    %46 = arith.addf %42, %45 : vector<32x64xf32>
    %47 = vector.extract_strided_slice %46 {offsets = [0, 0], sizes = [32, 32], strides = [1, 1]} : vector<32x64xf32> to vector<32x32xf32>
    %48 = math.tanh %47 : vector<32x32xf32>
    %49 = vector.extract_strided_slice %46 {offsets = [0, 32], sizes = [32, 32], strides = [1, 1]} : vector<32x64xf32> to vector<32x32xf32>
    %50 = arith.negf %49 : vector<32x32xf32>
    %51 = math.exp %50 : vector<32x32xf32>
    %cst_16 = arith.constant 1.000000e+00 : f32
    %52 = vector.broadcast %cst_16 : f32 to vector<32x32xf32>
    %53 = arith.addf %52, %51 : vector<32x32xf32>
    %54 = arith.divf %52, %53 : vector<32x32xf32>
    %55 = arith.mulf %48, %54 : vector<32x32xf32>
    %c0_17 = arith.constant 0 : index
    %c0_18 = arith.constant 0 : index
    %c0_19 = arith.constant 0 : index
    %56 = vector.load %arg11[%c0_17, %c0_18, %c0_19] : memref<1x32x64xf32, #tpu.memory_space<vmem>>, vector<1x32x64xf32>
    %57 = vector.shape_cast %56 : vector<1x32x64xf32> to vector<32x64xf32>
    %cst_20 = arith.constant dense<0.000000e+00> : vector<32x64xf32>
    %58 = tpu.matmul %55, %57, %cst_20 {dimension_numbers = #tpu.dot_dimension_numbers<[1], [0], [0], [1], [0, 0, 1, 1], [], []>} : vector<32x32xf32>, vector<32x64xf32>, vector<32x64xf32> -> vector<32x64xf32>
    %c0_21 = arith.constant 0 : index
    %c0_22 = arith.constant 0 : index
    %c0_23 = arith.constant 0 : index
    %59 = vector.load %arg12[%c0_21, %c0_22, %c0_23] : memref<1x1x64xf32, #tpu.memory_space<vmem>>, vector<1x1x64xf32>
    %60 = vector.shape_cast %59 : vector<1x1x64xf32> to vector<1x64xf32>
    %61 = vector.broadcast %60 : vector<1x64xf32> to vector<32x64xf32>
    %62 = arith.addf %58, %61 : vector<32x64xf32>
    %c8 = arith.constant 8 : index
    %c0_24 = arith.constant 0 : index
    %63 = vector.load %arg16[%c8, %c0_24] : memref<48x32xf32, #tpu.memory_space<vmem>>, vector<32x32xf32>
    %64 = vector.extract_strided_slice %62 {offsets = [0, 0], sizes = [32, 32], strides = [1, 1]} : vector<32x64xf32> to vector<32x32xf32>
    %65 = arith.addf %63, %64 : vector<32x32xf32>
    %66 = vector.broadcast %6 : vector<32x1xf32> to vector<32x32xf32>
    %67 = arith.mulf %65, %66 : vector<32x32xf32>
    %c8_25 = arith.constant 8 : index
    %c0_26 = arith.constant 0 : index
    %68 = vector.load %arg16[%c8_25, %c0_26] : memref<48x32xf32, #tpu.memory_space<vmem>>, vector<32x32xf32>
    tpu.vector_store %arg16[%c8_25, %c0_26], %67 {strides = array<i32>} : memref<48x32xf32, #tpu.memory_space<vmem>>, vector<32x32xf32>,
    %c0_27 = arith.constant 0 : index
    %c0_28 = arith.constant 0 : index
    %69 = vector.load %arg17[%c0_27, %c0_28] : memref<32x32xf32, #tpu.memory_space<vmem>>, vector<32x32xf32>
    %70 = vector.extract_strided_slice %62 {offsets = [0, 32], sizes = [32, 32], strides = [1, 1]} : vector<32x64xf32> to vector<32x32xf32>
    %71 = arith.addf %69, %70 : vector<32x32xf32>
    %c0_29 = arith.constant 0 : index
    %c0_30 = arith.constant 0 : index
    %72 = vector.load %arg17[%c0_29, %c0_30] : memref<32x32xf32, #tpu.memory_space<vmem>>, vector<32x32xf32>
    tpu.vector_store %arg17[%c0_29, %c0_30], %71 {strides = array<i32>} : memref<32x32xf32, #tpu.memory_space<vmem>>, vector<32x32xf32>,
    %c2_i32_31 = arith.constant 2 : i32
    %73 = arith.cmpi eq, %arg1, %c2_i32_31 : i32
    %74 = arith.extui %73 : i1 to i32
    %c0_i32_32 = arith.constant 0 : i32
    %75 = arith.cmpi ne, %74, %c0_i32_32 : i32
    scf.if %75 {
      %c0_33 = arith.constant 0 : index
      %c0_34 = arith.constant 0 : index
      %76 = vector.load %arg17[%c0_33, %c0_34] : memref<32x32xf32, #tpu.memory_space<vmem>>, vector<32x32xf32>
      %77 = vector.broadcast %6 : vector<32x1xf32> to vector<32x32xf32>
      %78 = arith.mulf %76, %77 : vector<32x32xf32>
      %c0_35 = arith.constant 0 : index
      %c0_36 = arith.constant 0 : index
      %79 = vector.load %arg13[%c0_35, %c0_36] : memref<32x16xf32, #tpu.memory_space<vmem>>, vector<32x16xf32>
      %cst_37 = arith.constant dense<0.000000e+00> : vector<32x16xf32>
      %80 = tpu.matmul %78, %79, %cst_37 {dimension_numbers = #tpu.dot_dimension_numbers<[1], [0], [0], [1], [0, 0, 1, 1], [], []>} : vector<32x32xf32>, vector<32x16xf32>, vector<32x16xf32> -> vector<32x16xf32>
      %c0_38 = arith.constant 0 : index
      %c0_39 = arith.constant 0 : index
      %81 = vector.load %arg14[%c0_38, %c0_39] : memref<1x16xf32, #tpu.memory_space<vmem>>, vector<1x16xf32>
      %82 = vector.broadcast %81 : vector<1x16xf32> to vector<32x16xf32>
      %83 = arith.addf %80, %82 : vector<32x16xf32>
      %84 = vector.broadcast %6 : vector<32x1xf32> to vector<32x16xf32>
      %85 = arith.mulf %83, %84 : vector<32x16xf32>
      %86 = vector.extract_strided_slice %85 {offsets = [0, 0], sizes = [32, 8], strides = [1, 1]} : vector<32x16xf32> to vector<32x8xf32>
      %87 = vector.extract_strided_slice %85 {offsets = [0, 8], sizes = [32, 8], strides = [1, 1]} : vector<32x16xf32> to vector<32x8xf32>
      %c0_40 = arith.constant 0 : index
      %c0_41 = arith.constant 0 : index
      %c0_42 = arith.constant 0 : index
      %88 = vector.load %arg6[%c0_40, %c0_41, %c0_42] : memref<1x32x8xf32, #tpu.memory_space<vmem>>, vector<1x32x8xf32>
      %89 = vector.shape_cast %88 : vector<1x32x8xf32> to vector<32x8xf32>
      %90 = math.exp %87 : vector<32x8xf32>
      %91 = arith.mulf %89, %90 : vector<32x8xf32>
      %92 = arith.addf %86, %91 : vector<32x8xf32>
      %93 = vector.broadcast %6 : vector<32x1xf32> to vector<32x8xf32>
      %94 = arith.mulf %92, %93 : vector<32x8xf32>
      %95 = tpu.concatenate %94, %85 in 1 : vector<32x8xf32>, vector<32x16xf32> -> vector<32x24xf32>
      %c0_43 = arith.constant 0 : index
      %c0_44 = arith.constant 0 : index
      %c0_45 = arith.constant 0 : index
      %96 = vector.load %arg15[%c0_43, %c0_44, %c0_45] : memref<1x32x24xf32, #tpu.memory_space<vmem>>, vector<1x32x24xf32>
      %97 = vector.shape_cast %96 : vector<1x32x24xf32> to vector<32x24xf32>
      %98 = vector.shape_cast %95 : vector<32x24xf32> to vector<1x32x24xf32>
      tpu.vector_store %arg15[%c0_43, %c0_44, %c0_45], %98 {strides = array<i32>} : memref<1x32x24xf32, #tpu.memory_space<vmem>>, vector<1x32x24xf32>,
    } else {
    }
    return
  }
  func.func @transform_0(%arg0: i32, %arg1: i32, %arg2: memref<2xi32, #tpu.memory_space<smem>>, %arg3: memref<3xi32, #tpu.memory_space<smem>>, %arg4: memref<3xi32, #tpu.memory_space<smem>>) -> (i32, i32, i32) {
    %c0_i32 = arith.constant 0 : i32
    %c0_i32_0 = arith.constant 0 : i32
    %c0_i32_1 = arith.constant 0 : i32
    return %arg0, %c0_i32, %c0_i32_0 : i32, i32, i32
  }
  func.func @transform_1(%arg0: i32, %arg1: i32, %arg2: memref<2xi32, #tpu.memory_space<smem>>, %arg3: memref<3xi32, #tpu.memory_space<smem>>, %arg4: memref<3xi32, #tpu.memory_space<smem>>) -> (i32, i32, i32) {
    %c0_i32 = arith.constant 0 : i32
    %c0_i32_0 = arith.constant 0 : i32
    %c0_i32_1 = arith.constant 0 : i32
    return %arg0, %c0_i32, %c0_i32_0 : i32, i32, i32
  }
  func.func @transform_2(%arg0: i32, %arg1: i32, %arg2: memref<2xi32, #tpu.memory_space<smem>>, %arg3: memref<3xi32, #tpu.memory_space<smem>>, %arg4: memref<3xi32, #tpu.memory_space<smem>>) -> (i32, i32) {
    %c0_i32 = arith.constant 0 : i32
    %c0_i32_0 = arith.constant 0 : i32
    %c0_i32_1 = arith.constant 0 : i32
    return %c0_i32, %c0_i32_0 : i32, i32
  }
  func.func @transform_3(%arg0: i32, %arg1: i32, %arg2: memref<2xi32, #tpu.memory_space<smem>>, %arg3: memref<3xi32, #tpu.memory_space<smem>>, %arg4: memref<3xi32, #tpu.memory_space<smem>>) -> (i32, i32) {
    %c0_i32 = arith.constant 0 : i32
    %c0_i32_0 = arith.constant 0 : i32
    %c0_i32_1 = arith.constant 0 : i32
    return %c0_i32, %c0_i32_0 : i32, i32
  }
  func.func @transform_4(%arg0: i32, %arg1: i32, %arg2: memref<2xi32, #tpu.memory_space<smem>>, %arg3: memref<3xi32, #tpu.memory_space<smem>>, %arg4: memref<3xi32, #tpu.memory_space<smem>>) -> (i32, i32, i32) {
    %c0_i32 = arith.constant 0 : i32
    %c0_i32_0 = arith.constant 0 : i32
    %c0_i32_1 = arith.constant 0 : i32
    return %arg1, %c0_i32, %c0_i32_0 : i32, i32, i32
  }
  func.func @transform_5(%arg0: i32, %arg1: i32, %arg2: memref<2xi32, #tpu.memory_space<smem>>, %arg3: memref<3xi32, #tpu.memory_space<smem>>, %arg4: memref<3xi32, #tpu.memory_space<smem>>) -> (i32, i32, i32) {
    %c0_i32 = arith.constant 0 : i32
    %c0_i32_0 = arith.constant 0 : i32
    %c0_i32_1 = arith.constant 0 : i32
    return %arg1, %c0_i32, %c0_i32_0 : i32, i32, i32
  }
  func.func @transform_6(%arg0: i32, %arg1: i32, %arg2: memref<2xi32, #tpu.memory_space<smem>>, %arg3: memref<3xi32, #tpu.memory_space<smem>>, %arg4: memref<3xi32, #tpu.memory_space<smem>>) -> (i32, i32, i32) {
    %c0_i32 = arith.constant 0 : i32
    %c0_i32_0 = arith.constant 0 : i32
    %c0_i32_1 = arith.constant 0 : i32
    return %arg1, %c0_i32, %c0_i32_0 : i32, i32, i32
  }
  func.func @transform_7(%arg0: i32, %arg1: i32, %arg2: memref<2xi32, #tpu.memory_space<smem>>, %arg3: memref<3xi32, #tpu.memory_space<smem>>, %arg4: memref<3xi32, #tpu.memory_space<smem>>) -> (i32, i32, i32) {
    %c0_i32 = arith.constant 0 : i32
    %c0_i32_0 = arith.constant 0 : i32
    %c0_i32_1 = arith.constant 0 : i32
    return %arg1, %c0_i32, %c0_i32_0 : i32, i32, i32
  }
  func.func @transform_8(%arg0: i32, %arg1: i32, %arg2: memref<2xi32, #tpu.memory_space<smem>>, %arg3: memref<3xi32, #tpu.memory_space<smem>>, %arg4: memref<3xi32, #tpu.memory_space<smem>>) -> (i32, i32) {
    %c0_i32 = arith.constant 0 : i32
    %c0_i32_0 = arith.constant 0 : i32
    %c0_i32_1 = arith.constant 0 : i32
    return %c0_i32, %c0_i32_0 : i32, i32
  }
  func.func @transform_9(%arg0: i32, %arg1: i32, %arg2: memref<2xi32, #tpu.memory_space<smem>>, %arg3: memref<3xi32, #tpu.memory_space<smem>>, %arg4: memref<3xi32, #tpu.memory_space<smem>>) -> (i32, i32) {
    %c0_i32 = arith.constant 0 : i32
    %c0_i32_0 = arith.constant 0 : i32
    %c0_i32_1 = arith.constant 0 : i32
    return %c0_i32, %c0_i32_0 : i32, i32
  }
  func.func @transform_10(%arg0: i32, %arg1: i32, %arg2: memref<2xi32, #tpu.memory_space<smem>>, %arg3: memref<3xi32, #tpu.memory_space<smem>>, %arg4: memref<3xi32, #tpu.memory_space<smem>>) -> (i32, i32, i32) {
    %c0_i32 = arith.constant 0 : i32
    %c0_i32_0 = arith.constant 0 : i32
    %c0_i32_1 = arith.constant 0 : i32
    return %arg0, %c0_i32, %c0_i32_0 : i32, i32, i32
  }
}

</mosaic_0001>

<bundles_post_ra>
// kernel: tpu_custom_call.1
= control target key start
LH: loop header
LB: loop body
LE: loop exit
PB: predicated region body
PF: predicated region fallthrough
CT: control target
= control target key end

     0   :  { %s2076_s0 = inlined_call_operand.vmem [shape: s32[2], index: 0, kind: input, shape index: {}]   ;;  %s2077_s3 = inlined_call_operand.vmem [shape: f32[2,32,16], index: 3, kind: input, shape index: {}]   ;;  %s2078_s4 = inlined_call_operand.vmem [shape: f32[2,32,8], index: 4, kind: input, shape index: {}]   ;;  %s2079_s5 = inlined_call_operand.vmem [shape: f32[16,32], index: 5, kind: input, shape index: {}]   ;;  %s2080_s6 = inlined_call_operand.vmem [shape: f32[1,32], index: 6, kind: input, shape index: {}]   ;;  %s2081_s7 = inlined_call_operand.vmem [shape: f32[3,160,64], index: 7, kind: input, shape index: {}]   ;;  %s2082_s8 = inlined_call_operand.vmem [shape: f32[3,1,64], index: 8, kind: input, shape index: {}]   ;;  %s2083_s9 = inlined_call_operand.vmem [shape: f32[3,32,64], index: 9, kind: input, shape index: {}]   ;;  %s2084_s10 = inlined_call_operand.vmem [shape: f32[3,1,64], index: 10, kind: input, shape index: {}]   ;;  %s2085_s11 = inlined_call_operand.vmem [shape: f32[32,16], index: 11, kind: input, shape index: {}]   ;;  %s2086_s12 = inlined_call_operand.vmem [shape: f32[1,16], index: 12, kind: input, shape index: {}]   ;;  %s2087_s13 = inlined_call_operand.vmem [shape: f32[2,32,24], index: 13, kind: output, shape index: {}]   ;;  %s2088_s1 = inlined_call_operand.vmem [shape: s32[3], index: 1, kind: input, shape index: {}]   ;;  %s2089_s2 = inlined_call_operand.vmem [shape: s32[3], index: 2, kind: input, shape index: {}]  }
   0x1   :  { %2092 = sst [smem:[#allocation13_spill]] %s2077_s3  ;;  %s18_s27 = sshll.u32 %s2076_s0, 4  ;;  %s19_s27 = int_to_ptr.vmem [resolvable:$true] %s18_s27 }
   0x2   :  { %s22_s30 = sshll.u32 %s2088_s1, 4  ;;  %s1596_s14 = scalar_lea.vmem %s19_s27, 16  ;;  %s23_s30 = int_to_ptr.vmem [resolvable:$true] %s22_s30 }
   0x3   :  { %p1597_p0 = scmp.ne.s32.totalorder %s19_s27, %s1596_s14  ;;  %p1601_p1 = scmp.lt.s32.totalorder %s19_s27, %s19_s27 }
   0x4   :  { %p1602_p2 = scmp.lt.s32.totalorder %s1596_s14, %s1596_s14 }
   0x6   :  { %p1603_p3 = por %p1602_p2, %p1601_p1 }
   0x8   :  { %p1604_p4 = pnand %p1603_p3, %p1597_p0 }
   0xa   :  { %1607 = shalt.err (!%p1604_p4)  }
   0xb   :  { %s1674_s15 = smov [#allocation5]   ;;  %s1608_s16 = scalar_lea.vmem %s23_s30, 16 }
   0xc   :  { %21 = dma.vmem_to_smem %s19_s27, 16, %s1674_s15, [#allocation4] }
   0xd   :  { %p1609_p5 = scmp.ne.s32.totalorder %s23_s30, %s1608_s16  ;;  %p1613_p6 = scmp.lt.s32.totalorder %s23_s30, %s23_s30 }
   0xe   :  { %p1614_p7 = scmp.lt.s32.totalorder %s1608_s16, %s1608_s16 }
  0x10   :  { %p1615_p8 = por %p1614_p7, %p1613_p6 }
  0x12   :  { %p1616_p9 = pnand %p1615_p8, %p1609_p5 }
  0x14   :  { %1619 = shalt.err (!%p1616_p9)  }
  0x15   :  { %s1675_s0 = smov [#allocation6]   ;;  %s26_s18 = sshll.u32 %s2089_s2, 4  ;;  %s27_s18 = int_to_ptr.vmem [resolvable:$true] %s26_s18 }
  0x16   :  { %25 = dma.vmem_to_smem %s23_s30, 16, %s1675_s0, [#allocation4] }
  0x17   :  { %s1620_s19 = scalar_lea.vmem %s27_s18, 16  ;;  %p1625_p11 = scmp.lt.s32.totalorder %s27_s18, %s27_s18 }
  0x18   :  { %p1621_p10 = scmp.ne.s32.totalorder %s27_s18, %s1620_s19  ;;  %p1626_p12 = scmp.lt.s32.totalorder %s1620_s19, %s1620_s19 }
  0x1a   :  { %p1627_p13 = por %p1626_p12, %p1625_p11 }
  0x1c   :  { %p1628_p0 = pnand %p1627_p13, %p1621_p10 }
  0x1e   :  { %1631 = shalt.err (!%p1628_p0)  }
  0x1f   :  { %s1676_s20 = smov [#allocation7]  }
  0x20   :  { %29 = dma.vmem_to_smem %s27_s18, 16, %s1676_s20, [#allocation4] }
  0x21   :  { %1652 = dma.done.wait [#allocation4], 48 }
  0x22   :  { %1653 = vsyncadd [#allocation4], 4294967248 }
  0x23   :  { %31 = sfence }
  0x24   :  { %s1763_s21 = smov 0   ;;  %s1765_s22 = smov 0  }
  0x25   :  { %s1767_s23 = smov 0   ;;  %s1769_s2 = smov 0  }
  0x26   :  { %s1771_s24 = smov 0  }
  0x27 LB: > { %2093 = sst [smem:[#allocation9_spill]] %s1664_s23  ;;  %s46_s25 = sadd.s32 1, %s1664_s23  ;;  %s1672_s24 = sphi %s1771_s24, %s37_s24   ;;  %s1668_s2 = sphi %s1769_s2, %s2101_s2   ;;  %s1664_s23 = sphi %s1767_s23, %s2100_s23   ;;  %s1660_s22 = sphi %s1765_s22, %s2099_s22   ;;  %s1656_s21 = sphi %s1763_s21, %s2098_s21  }
  0x28   : > { %2094 = sst [smem:[#allocation10_spill]] %s1668_s2  ;;  %s49_s26 = sadd.s32 1, %s1668_s2 }
  0x29   : > { %p47_p1 = scmp.ge.s32.totalorder %s46_s25, 3  ;;  %p1378_p2 = scmp.ge.s32.totalorder %s1672_s24, 1 }
  0x2a   : > { %p387_p3 = scmp.lt.s32.totalorder %s1672_s24, 7 }
  0x2b   : > { %s2103_s25 = smov (%p47_p1, %s46_s25), 0  ;;  %s2105_s26 = smov (!%p47_p1, %s49_s26), %s1668_s2 }
  0x2c   : > { %2095 = sst [smem:[#allocation11_spill]] %s2103_s25  ;;  %p388_p4 = pnand %p1378_p2, %p387_p3 }
  0x2d   : > { %p51_p5 = scmp.ge.s32.totalorder %s2105_s26, 2  ;;  %p446_p6 = scmp.lt.s32.totalorder (!%p388_p4), %s1660_s22, 1 }
  0x2e   : > { %391 = sbr.rel (%p388_p4) target bundleno = 1429 (0x595), region = 60  ;;  %p456_p7 = scmp.lt.s32.totalorder (!%p388_p4), %s1656_s21, 2 }
  0x2f   : > { %s2107_s26 = smov (%p51_p5, %s2105_s26), 0  ;;  %s482_s27 = sld [smem:[#allocation5 + %s1660_s22]] (!%p388_p4) }
  0x30   : > { %2096 = sst [smem:[#allocation12_spill]] %s2107_s26  ;;  %p1392_p8 = scmp.ne.s32.totalorder (!%p388_p4), %s1656_s21, 0 }
  0x31   : > { %s2097_s3 = sld [smem:[#allocation13_spill]] (!%p388_p4) }
  0x33   : > { %v477_v0 = vlaneseq  ;;  %s2109_s22 = smov (!%p446_p6, %s1660_s22), 1  ;;  %v1677_v6 = vmov 0.0  }
  0x34   : > { %s1797_s28 = scalar_select %p456_p7, %s1656_s21, 2 }
  0x35   : > { %v478_v1 = vshrl.u32 %v477_v0, 7  ;;  %s1422_s29 = sshll.u32 %s2109_s22, 5  ;;  %v483_v5 = vstv %s482_s27 }
  0x36   : > { %s1807_s1 = scalar_lea.vmem %s2078_s4, %s1422_s29  ;;  %s1498_s17 = smul.u32 160, %s1797_s28 }
  0x37   : > { %v479_v2 = vadd.s32 8, %v478_v1  ;;  %v480_v3 = vadd.s32 16, %v478_v1  ;;  %v481_v4 = vadd.s32 24, %v478_v1  ;;  %s1802_s15 = scalar_lea.vmem %s2097_s3, %s1422_s29  ;;  %s463_s20 = scalar_lea.vmem %s2082_s8, %s1797_s28  ;;  %vm484_vm0 = vcmp.lt.s32.totalorder %v478_v1, %v483_v5 }
  0x38   : > { %s1424_s26 = sshll.u32 %s1797_s28, 5  ;;  %s471_s2 = scalar_lea.vmem %s2084_s10, %s1797_s28  ;;  %v1835_v7 = vsel %vm484_vm0, 1.0, %v1677_v6 }
  0x39   : > { %s1822_s14 = scalar_lea.vmem %s2081_s7, %s1498_s17  ;;  %s1827_s0 = scalar_lea.vmem %s2083_s9, %s1424_s26  ;;  %vm485_vm1 = vcmp.lt.s32.totalorder %v479_v2, %v483_v5  ;;  %vm486_vm2 = vcmp.lt.s32.totalorder %v480_v3, %v483_v5  ;;  %vm487_vm3 = vcmp.lt.s32.totalorder %v481_v4, %v483_v5 }
  0x3a   : > { %s1832_s25 = scalar_lea.vmem %s2087_s13, %s1422_s29  ;;  %v1838_v8 = vsel %vm485_vm1, 1.0, %v1677_v6  ;;  %v1841_v9 = vsel %vm486_vm2, 1.0, %v1677_v6  ;;  %v1844_v10 = vsel %vm487_vm3, 1.0, %v1677_v6  ;;  %499 = sbr.rel (%p1392_p8) target bundleno = 269 (0x10d), region = 64 }
  0x3f   : > { %v516_v11 = vld [vmem:[%s2079_s5 + $0x8] sm:$0xff]  ;;  %v515_v12 = vld [vmem:[%s2079_s5] sm:$0xff]  ;;  %vm500_vm4 = vcmask 261120   ;;  %v1678_v13 = vmov 0.0   ;;  %vm524_vm5 = vcmask 130048   ;;  %v513_v15 = vld [vmem:[%s1802_s15 + $0x10] sm:$0xff] }
  0x40   : > { %1448 = vmatprep.subr.mxu0 %v516_v11  ;;  %1486 = vmatprep.subr.mxu1 %v516_v11  ;;  %501 = vst.msk [vmem:[#allocation2] sm:$0xff] %vm500_vm4, %v1678_v13  ;;  %503 = vst.msk [vmem:[#allocation2 + $0x10] sm:$0xff] %vm500_vm4, %v1678_v13  ;;  %v511_v14 = vld [vmem:[%s1802_s15] sm:$0xff]  ;;  %v512_v16 = vld [vmem:[%s1802_s15 + $0x8] sm:$0xff] }
  0x41   : > { %506 = vst.msk [vmem:[#allocation2 + $0x28] sm:$0xff] %vm500_vm4, %v1678_v13  ;;  %507 = vst.msk [vmem:[#allocation3] sm:$0xff] %vm500_vm4, %v1678_v13  ;;  %1449 = vmatpush3.msra.mxu0 %v516_v11  ;;  %1488 = vmatpush3.msra.mxu1 %v516_v11  ;;  %v514_v17 = vld [vmem:[%s1802_s15 + $0x18] sm:$0xff]  ;;  %v1393_v18 = vld [vmem:[%s2080_s6] ss:$0 sm:$0xff] }
  0x42   : > { %508 = vst.msk [vmem:[#allocation3 + $0x8] sm:$0xff] %vm500_vm4, %v1678_v13  ;;  %509 = vst.msk [vmem:[#allocation3 + $0x10] sm:$0xff] %vm500_vm4, %v1678_v13  ;;  %1450 = vmatprep.subr.mxu0 %v515_v12  ;;  %1487 = vmatprep.subr.mxu1 %v515_v12 }
  0x43   : > { %510 = vst.msk [vmem:[#allocation3 + $0x18] sm:$0xff] %vm500_vm4, %v1678_v13  ;;  %502 = vst.msk [vmem:[#allocation2 + $0x8] sm:$0xff] %vm500_vm4, %v1678_v13  ;;  %1451 = vmatpush3.msra.mxu0 %v515_v12  ;;  %1489 = vmatpush3.msra.mxu1 %v515_v12 }
  0x44   : > { %504 = vst.msk [vmem:[#allocation2 + $0x18] sm:$0xff] %vm500_vm4, %v1678_v13  ;;  %505 = vst.msk [vmem:[#allocation2 + $0x20] sm:$0xff] %vm500_vm4, %v1678_v13  ;;  %1452 = vmatprep.mubr.msk.f32.mxu0 %vm524_vm5, %v511_v14  ;;  %1455 = vmatprep.mubr.msk.f32.mxu1 %vm524_vm5, %v513_v15 }
  0x45   : > { %1453 = vmatmul.mubr.msk.f32.vlgmr.msra.gmra.mxu0 %vm524_vm5, %v512_v16  ;;  %1456 = vmatmul.mubr.msk.f32.vlgmr.msra.gmra.mxu1 %vm524_vm5, %v514_v17 }
 0x105   : > { %v1454_v19 = vpop.f32.mrf.mxu0  ;;  %v1457_v20 = vpop.f32.mrf.mxu1 }
 0x106   : > { %v609_v21 = vadd.f32 %v1454_v19, %v1393_v18  ;;  %v619_v22 = vadd.f32 %v1457_v20, %v1393_v18 }
 0x107   : > { %v603_v23 = vpop.f32.mrf.mxu0  ;;  %v613_v24 = vpop.f32.mrf.mxu1 }
 0x108   : > { %v623_v25 = vmul.f32 %v1838_v8, %v609_v21  ;;  %v625_v26 = vmul.f32 %v1844_v10, %v619_v22  ;;  %v604_v27 = vadd.f32 %v1393_v18, %v603_v23  ;;  %v614_v28 = vadd.f32 %v1393_v18, %v613_v24 }
 0x10a   : > { %627 = vst.msk [vmem:[#allocation2 + $0x10] sm:$0xff] %vm500_vm4, %v623_v25  ;;  %629 = vst.msk [vmem:[#allocation2 + $0x20] sm:$0xff] %vm500_vm4, %v625_v26  ;;  %v622_v29 = vmul.f32 %v1835_v7, %v604_v27  ;;  %v624_v30 = vmul.f32 %v1841_v9, %v614_v28 }
 0x10c   : > { %626 = vst.msk [vmem:[#allocation2 + $0x8] sm:$0xff] %vm500_vm4, %v622_v29  ;;  %628 = vst.msk [vmem:[#allocation2 + $0x18] sm:$0xff] %vm500_vm4, %v624_v30 }
 0x10d PF: > { %s1879_s15 = sld [smem:[#allocation6 + %s1656_s21]]  ;;  %767 = vmatprep.subr.mxu0 %v1677_v6  ;;  %v743_v31 = vld [vmem:[%s1822_s14 + $0x78] sm:$0xff]  ;;  %v742_v32 = vld [vmem:[%s1822_s14 + $0x70] sm:$0xff]  ;;  %v741_v33 = vld [vmem:[%s1822_s14 + $0x68] sm:$0xff]  ;;  %vm713_vm6 = vcmask 261120   ;;  %vm718_vm7 = vcmask 523264  }
 0x10e   : > { %s631_s22 = sld [smem:[#allocation7 + %s1656_s21]]  ;;  %768 = vmatpush1.msra.mxu0 %v743_v31  ;;  %v740_v34 = vld [vmem:[%s1822_s14 + $0x60] sm:$0xff]  ;;  %v739_v35 = vld [vmem:[%s1822_s14 + $0x58] sm:$0xff]  ;;  %v738_v36 = vld [vmem:[%s1822_s14 + $0x50] sm:$0xff]  ;;  %vm723_vm8 = vcmask 785408   ;;  %p1414_p9 = scmp.ne.s32.totalorder %s1656_s21, 2 }
 0x10f   : > { %769 = vmatprep.subr.mxu0 %v1677_v6  ;;  %v737_v37 = vld [vmem:[%s1822_s14 + $0x48] sm:$0xff]  ;;  %v736_v46 = vld [vmem:[%s1822_s14 + $0x40] sm:$0xff]  ;;  %v735_v48 = vld [vmem:[%s1822_s14 + $0x38] sm:$0xff] }
 0x110   : > { %770 = vmatpush1.msra.mxu0 %v742_v32  ;;  %v734_v51 = vld [vmem:[%s1822_s14 + $0x30] sm:$0xff]  ;;  %v733_v53 = vld [vmem:[%s1822_s14 + $0x28] sm:$0xff]  ;;  %v732_v55 = vld [vmem:[%s1822_s14 + $0x20] sm:$0xff] }
 0x111   : > { %771 = vmatprep.subr.mxu0 %v1677_v6  ;;  %v731_v57 = vld [vmem:[%s1822_s14 + $0x18] sm:$0xff]  ;;  %v730_v59 = vld [vmem:[%s1822_s14 + $0x10] sm:$0xff]  ;;  %v729_v61 = vld [vmem:[%s1822_s14 + $0x8] sm:$0xff] }
 0x112   : > { %772 = vmatpush1.msra.mxu0 %v741_v33  ;;  %v728_v62 = vld [vmem:[%s1822_s14] sm:$0xff]  ;;  %v747_v63 = vld [vmem:[%s1822_s14 + $0x98] sm:$0xff]  ;;  %v746_v0 = vld [vmem:[%s1822_s14 + $0x90] sm:$0xff] }
 0x113   : > { %s651_s30 = smul.u32 3, %s1879_s15  ;;  %s1398_s16 = sshll.u32 %s1879_s15, 1  ;;  %773 = vmatprep.subr.mxu0 %v1677_v6  ;;  %v745_v1 = vld [vmem:[%s1822_s14 + $0x88] sm:$0xff]  ;;  %v744_v2 = vld [vmem:[%s1822_s14 + $0x80] sm:$0xff] }
 0x114   : > { %s1893_s18 = ssub.s32 8, %s631_s22  ;;  %774 = vmatpush1.msra.mxu0 %v740_v34  ;;  %s1399_s19 = sshll.u32 %s1879_s15, 2 }
 0x115   : > { %s638_s3 = sadd.s32 %s1893_s18, %s1879_s15  ;;  %s652_s23 = sadd.s32 %s651_s30, %s1893_s18  ;;  %775 = vmatprep.subr.mxu0 %v1677_v6 }
 0x116   : > { %776 = vmatpush1.msra.mxu0 %v739_v35  ;;  %s1902_s26 = scalar_lea.vmem [#allocation2], %s638_s3  ;;  %s1906_s27 = scalar_lea.vmem [#allocation2], %s652_s23 }
 0x117   : > { %v640_v38 = vld [vmem:[%s1902_s26] sm:$0xff]  ;;  %v641_v39 = vld [vmem:[%s1902_s26 + $0x8] sm:$0xff]  ;;  %s645_s29 = sadd.s32 %s1398_s16, %s1893_s18  ;;  %777 = vmatprep.subr.mxu0 %v1677_v6  ;;  %s659_s17 = sadd.s32 %s1399_s19, %s1893_s18  ;;  %v642_v50 = vld [vmem:[%s1902_s26 + $0x10] sm:$0xff] }
 0x118   : > { %v654_v40 = vld [vmem:[%s1906_s27] sm:$0xff]  ;;  %v1549_v41 = vpack.i.bf16 %v641_v39, %v640_v38  ;;  %v655_v42 = vld [vmem:[%s1906_s27 + $0x8] sm:$0xff]  ;;  %778 = vmatpush1.msra.mxu0 %v738_v36  ;;  %s1913_s15 = scalar_lea.vmem [#allocation2], %s645_s29  ;;  %s1679_s22 = smov 32   ;;  %v656_v54 = vld [vmem:[%s1906_s27 + $0x10] sm:$0xff] }
 0x119   : > { %v1559_v43 = vpack.i.bf16 %v655_v42, %v654_v40  ;;  %v647_v44 = vld [vmem:[%s1913_s15] sm:$0xff]  ;;  %v648_v45 = vld [vmem:[%s1913_s15 + $0x8] sm:$0xff]  ;;  %779 = vmatprep.subr.mxu0 %v1677_v6  ;;  %s1680_s30 = smov 96   ;;  %s1923_s16 = scalar_lea.vmem [#allocation2], %s659_s17  ;;  %v649_v52 = vld [vmem:[%s1913_s15 + $0x10] sm:$0xff] }
 0x11a   : > { %1550 = vrot.lane.b32.xlu0 %v1549_v41, %s1679_s22  ;;  %v1554_v47 = vpack.i.bf16 %v648_v45, %v647_v44  ;;  %780 = vmatpush1.msra.mxu0 %v737_v37  ;;  %v661_v49 = vld [vmem:[%s1923_s16] sm:$0xff]  ;;  %s1681_s19 = smov 64   ;;  %v643_v56 = vld [vmem:[%s1902_s26 + $0x18] sm:$0xff]  ;;  %s633_s3 = scalar_lea.vmem [#allocation2], %s1893_s18  ;;  %v662_v21 = vld [vmem:[%s1923_s16 + $0x8] sm:$0xff] }
 0x11b   : > { %1560 = vrot.lane.b32.xlu1 %v1559_v43, %s1680_s30  ;;  %781 = vmatprep.subr.mxu0 %v1677_v6  ;;  %v650_v58 = vld [vmem:[%s1913_s15 + $0x18] sm:$0xff]  ;;  %v634_v11 = vld [vmem:[%s633_s3] sm:$0xff]  ;;  %v635_v18 = vld [vmem:[%s633_s3 + $0x8] sm:$0xff] }
 0x11c   : > { %782 = vmatpush1.msra.mxu0 %v736_v46  ;;  %1401 = vmatprep.mubr.msk.f32.mxu0 %vm713_vm6, %v661_v49  ;;  %v657_v60 = vld [vmem:[%s1906_s27 + $0x18] sm:$0xff]  ;;  %v663_v30 = vld [vmem:[%s1923_s16 + $0x10] sm:$0xff]  ;;  %v1400_v42 = vld [vmem:[%s463_s20] ss:$0 sm:$0xff] }
 0x11d   : > { %783 = vmatprep.subr.mxu0 %v1677_v6  ;;  %v637_v29 = vld [vmem:[%s633_s3 + $0x18] sm:$0xff] }
 0x11e   : > { %1555 = vrot.lane.b32.xlu0 %v1554_v47, %s1681_s19  ;;  %784 = vmatpush1.msra.mxu0 %v735_v48  ;;  %v664_v36 = vld [vmem:[%s1923_s16 + $0x18] sm:$0xff]  ;;  %s1683_s16 = smov (!%p1414_p9), 8  }
 0x11f   : > { %673 = vrot.lane.b32.xlu1 %v642_v50, %s1679_s22  ;;  %785 = vmatprep.subr.mxu0 %v1677_v6  ;;  %v903_v41 = vld [vmem:[%s1827_s0 + $0x18] sm:$0xff] }
 0x120   : > { %786 = vmatpush1.msra.mxu0 %v734_v51  ;;  %1458 = vmatprep.subr.mxu1 %v903_v41 }
 0x121   : > { %787 = vmatprep.subr.mxu0 %v1677_v6  ;;  %1459 = vmatpush3.msra.mxu1 %v903_v41  ;;  %v1010_v41 = vld [vmem:[#allocation2 + $0x18] sm:$0xff] }
 0x122   : > { %689 = vrot.lane.b32.xlu0 %v649_v52, %s1681_s19  ;;  %788 = vmatpush1.msra.mxu0 %v733_v53 }
 0x123   : > { %705 = vrot.lane.b32.xlu1 %v656_v54, %s1680_s30  ;;  %789 = vmatprep.subr.mxu0 %v1677_v6 }
 0x124   : > { %790 = vmatpush1.msra.mxu0 %v732_v55 }
 0x125   : > { %791 = vmatprep.subr.mxu0 %v1677_v6 }
 0x126   : > { %675 = vrot.lane.b32.xlu0 %v643_v56, %s1679_s22  ;;  %792 = vmatpush1.msra.mxu0 %v731_v57 }
 0x127   : > { %691 = vrot.lane.b32.xlu1 %v650_v58, %s1681_s19  ;;  %793 = vmatprep.subr.mxu0 %v1677_v6 }
 0x128   : > { %794 = vmatpush1.msra.mxu0 %v730_v59 }
 0x129   : > { %795 = vmatprep.subr.mxu0 %v1677_v6 }
 0x12a   : > { %707 = vrot.lane.b32.xlu0 %v657_v60, %s1680_s30  ;;  %796 = vmatpush1.msra.mxu0 %v729_v61  ;;  %v902_v61 = vld [vmem:[%s1827_s0 + $0x10] sm:$0xff] }
 0x12b   : > { %797 = vmatprep.subr.mxu0 %v1677_v6  ;;  %1460 = vmatprep.subr.mxu1 %v902_v61 }
 0x12c   : > { %798 = vmatpush1.msra.mxu0 %v728_v62  ;;  %1461 = vmatpush3.msra.mxu1 %v902_v61 }
 0x12d   : > { %823 = vmatprep.subr.mxu0 %v1677_v6 }
 0x12e   : > { %824 = vmatpush2.msra.mxu0 %v747_v63  ;;  %v901_v63 = vld [vmem:[%s1827_s0 + $0x8] sm:$0xff] }
 0x12f   : > { %825 = vmatprep.subr.mxu0 %v1677_v6  ;;  %1462 = vmatprep.subr.mxu1 %v901_v63 }
 0x130   : > { %826 = vmatpush2.msra.mxu0 %v746_v0  ;;  %1463 = vmatpush3.msra.mxu1 %v901_v63 }
 0x131   : > { %827 = vmatprep.subr.mxu0 %v1677_v6 }
 0x132   : > { %828 = vmatpush2.msra.mxu0 %v745_v1  ;;  %v900_v1 = vld [vmem:[%s1827_s0] sm:$0xff] }
 0x133   : > { %829 = vmatprep.subr.mxu0 %v1677_v6  ;;  %v636_v6 = vld [vmem:[%s633_s3 + $0x10] sm:$0xff]  ;;  %1464 = vmatprep.subr.mxu1 %v900_v1 }
 0x134   : > { %830 = vmatpush2.msra.mxu0 %v744_v2  ;;  %1465 = vmatpush3.msra.mxu1 %v900_v1 }
 0x18c   : > { %v1551_v3 = vpop.permute.xlu0 %1550 }
 0x18d   : > { %v1561_v4 = vpop.permute.xlu1 %1560  ;;  %v1552_v5 = vunpack.i.l.bf16 %v1551_v3  ;;  %v1553_v12 = vunpack.i.h.bf16 %v1551_v3 }
 0x18e   : > { %v1562_v13 = vunpack.i.l.bf16 %v1561_v4  ;;  %v1563_v22 = vunpack.i.h.bf16 %v1561_v4 }
 0x18f   : > { %v714_v19 = vsel %vm713_vm6, %v634_v11, %v1552_v5  ;;  %v715_v25 = vsel %vm713_vm6, %v635_v18, %v1553_v12 }
 0x190   : > { %v1556_v14 = vpop.permute.xlu0 %1555 }
 0x191   : > { %v1558_v15 = vunpack.i.h.bf16 %v1556_v14  ;;  %v1557_v16 = vunpack.i.l.bf16 %v1556_v14  ;;  %v674_v17 = vpop.permute.xlu1 %673 }
 0x192   : > { %v716_v28 = vsel %vm713_vm6, %v636_v6, %v674_v17 }
 0x193   : > { %v719_v20 = vsel %vm718_vm7, %v714_v19, %v1557_v16  ;;  %v720_v27 = vsel %vm718_vm7, %v715_v25, %v1558_v15 }
 0x194   : > { %v690_v23 = vpop.permute.xlu0 %689  ;;  %v724_v24 = vsel %vm723_vm8, %v719_v20, %v1562_v13  ;;  %v725_v32 = vsel %vm723_vm8, %v720_v27, %v1563_v22 }
 0x195   : > { %832 = vmatmul.mubr.f32.vlgmr.msra.gmra.mxu0 %v724_v24  ;;  %v706_v26 = vpop.permute.xlu1 %705  ;;  %v721_v33 = vsel %vm718_vm7, %v716_v28, %v690_v23  ;;  %v1009_v28 = vld [vmem:[#allocation2 + $0x10] sm:$0xff] }
 0x196   : > { %1402 = vmatprep.mubr.msk.f32.mxu0 %vm713_vm6, %v662_v21  ;;  %v726_v37 = vsel %vm723_vm8, %v721_v33, %v706_v26  ;;  %v1409_v26 = vld [vmem:[%s471_s2] ss:$0 sm:$0xff] }
 0x198   : > { %v676_v31 = vpop.permute.xlu0 %675 }
 0x199   : > { %837 = vmatmul.mubr.f32.gmra.mxu0 %v725_v32  ;;  %v717_v34 = vsel %vm713_vm6, %v637_v29, %v676_v31  ;;  %v692_v35 = vpop.permute.xlu1 %691  ;;  %v1008_v31 = vld [vmem:[#allocation2 + $0x8] sm:$0xff] }
 0x19a   : > { %1403 = vmatprep.mubr.msk.f32.mxu0 %vm713_vm6, %v663_v30  ;;  %v722_v38 = vsel %vm718_vm7, %v717_v34, %v692_v35 }
 0x19c   : > { %v708_v39 = vpop.permute.xlu0 %707 }
 0x19d   : > { %842 = vmatmul.mubr.f32.gmra.mxu0 %v726_v37  ;;  %v727_v40 = vsel %vm723_vm8, %v722_v38, %v708_v39  ;;  %v1011_v38 = vld [vmem:[#allocation2 + $0x20] sm:$0xff] }
 0x19e   : > { %1404 = vmatprep.mubr.msk.f32.mxu0 %vm713_vm6, %v664_v36 }
 0x1a1   : > { %847 = vmatmul.mubr.f32.gmra.mxu0 %v727_v40 }
 0x255   : > { %v833_v43 = vpop.f32.mrf.mxu0 }
 0x256   : > { %v834_v44 = vadd.f32 %v1400_v42, %v833_v43 }
 0x257   : > { %v835_v45 = vpop.f32.mrf.mxu0 }
 0x258   : > { %v1405_v46 = vmul.f32 -1.442695, %v834_v44 }
 0x259   : > { %v838_v47 = vpop.f32.mrf.mxu0 }
 0x25a   : > { %1564 = vpow2.f32 %v1405_v46  ;;  %v839_v48 = vadd.f32 %v1400_v42, %v838_v47  ;;  %v1025_v47 = vld [vmem:[#allocation3 + $0x8] sm:$0xff] }
 0x25b   : > { %v840_v49 = vpop.f32.mrf.mxu0 }
 0x25c   : > { %v1406_v50 = vmul.f32 -1.442695, %v839_v48  ;;  %v1024_v49 = vld [vmem:[#allocation3] sm:$0xff] }
 0x25d   : > { %v843_v51 = vpop.f32.mrf.mxu0 }
 0x25e   : > { %1566 = vpow2.f32 %v1406_v50  ;;  %v844_v52 = vadd.f32 %v1400_v42, %v843_v51 }
 0x25f   : > { %v845_v53 = vpop.f32.mrf.mxu0 }
 0x260   : > { %v1407_v54 = vmul.f32 -1.442695, %v844_v52  ;;  %v1027_v53 = vld [vmem:[#allocation3 + $0x18] sm:$0xff] }
 0x261   : > { %v848_v55 = vpop.f32.mrf.mxu0 }
 0x262   : > { %1568 = vpow2.f32 %v1407_v54  ;;  %v849_v56 = vadd.f32 %v1400_v42, %v848_v55  ;;  %v1026_v55 = vld [vmem:[#allocation3 + $0x10] sm:$0xff] }
 0x263   : > { %v850_v57 = vpop.f32.mrf.mxu0 }
 0x264   : > { %v1408_v58 = vmul.f32 -1.442695, %v849_v56 }
 0x266   : > { %1570 = vpow2.f32 %v1408_v58 }
 0x267   : > { %v1565_v59 = vpop.eup %1564 }
 0x268   : > { %v868_v60 = vadd.f32 1.0, %v1565_v59 }
 0x26a   : > { %1572 = vrcp.f32 %v868_v60 }
 0x26b   : > { %v1567_v62 = vpop.eup %1566 }
 0x26c   : > { %v869_v0 = vadd.f32 1.0, %v1567_v62 }
 0x26e   : > { %1574 = vrcp.f32 %v869_v0 }
 0x26f   : > { %v1569_v2 = vpop.eup %1568 }
 0x270   : > { %v870_v3 = vadd.f32 1.0, %v1569_v2 }
 0x272   : > { %1576 = vrcp.f32 %v870_v3 }
 0x273   : > { %v1571_v4 = vpop.eup %1570 }
 0x274   : > { %v871_v5 = vadd.f32 1.0, %v1571_v4 }
 0x276   : > { %1578 = vrcp.f32 %v871_v5 }
 0x277   : > { %v1573_v11 = vpop.eup %1572  ;;  %1580 = vtanh.f32 %v834_v44 }
 0x278   : > { %884 = vrot.lane.b32.xlu1 %v1573_v11, %s1680_s30  ;;  %1582 = vtanh.f32 %v839_v48 }
 0x279   : > { %1584 = vtanh.f32 %v844_v52 }
 0x27a   : > { %1586 = vtanh.f32 %v849_v56 }
 0x27b   : > { %v1575_v12 = vpop.eup %1574 }
 0x27c   : > { %886 = vrot.lane.b32.xlu0 %v1575_v12, %s1680_s30 }
 0x27f   : > { %v1577_v13 = vpop.eup %1576 }
 0x280   : > { %888 = vrot.lane.b32.xlu1 %v1577_v13, %s1680_s30 }
 0x283   : > { %v1579_v14 = vpop.eup %1578 }
 0x284   : > { %890 = vrot.lane.b32.xlu0 %v1579_v14, %s1680_s30  ;;  %v1581_v15 = vpop.eup %1580 }
 0x285   : > { %v1583_v18 = vpop.eup %1582 }
 0x286   : > { %v1585_v20 = vpop.eup %1584 }
 0x287   : > { %v1587_v23 = vpop.eup %1586 }
 0x2ea   : > { %v885_v16 = vpop.permute.xlu1 %884 }
 0x2eb   : > { %v896_v17 = vmul.f32 %v1581_v15, %v885_v16 }
 0x2ed   : > { %1466 = vmatprep.mubr.msk.f32.mxu1 %vm713_vm6, %v896_v17 }
 0x2ee   : > { %v887_v19 = vpop.permute.xlu0 %886 }
 0x2ef   : > { %v897_v6 = vmul.f32 %v1583_v18, %v887_v19 }
 0x2f1   : > { %1467 = vmatmul.mubr.msk.f32.vlgmr.msra.gmra.mxu1 %vm713_vm6, %v897_v6 }
 0x2f2   : > { %v889_v21 = vpop.permute.xlu1 %888 }
 0x2f3   : > { %v898_v22 = vmul.f32 %v1585_v20, %v889_v21 }
 0x2f5   : > { %1469 = vmatprep.mubr.msk.f32.mxu1 %vm713_vm6, %v898_v22 }
 0x2f6   : > { %v891_v24 = vpop.permute.xlu0 %890 }
 0x2f7   : > { %v899_v25 = vmul.f32 %v1587_v23, %v891_v24 }
 0x2f9   : > { %1470 = vmatmul.mubr.msk.f32.gmra.mxu1 %vm713_vm6, %v899_v25 }
 0x3b1   : > { %v1468_v27 = vpop.f32.mrf.mxu1 }
 0x3b2   : > { %v995_v29 = vadd.f32 %v1468_v27, %v1409_v26 }
 0x3b3   : > { %v989_v30 = vpop.f32.mrf.mxu1 }
 0x3b4   : > { %v1013_v32 = vadd.f32 %v1009_v28, %v995_v29  ;;  %v990_v33 = vadd.f32 %v1409_v26, %v989_v30  ;;  %1034 = vrot.lane.b32.xlu0 %v995_v29, %s1680_s30 }
 0x3b6   : > { %v1017_v34 = vmul.f32 %v1838_v8, %v1013_v32  ;;  %v1012_v35 = vadd.f32 %v1008_v31, %v990_v33  ;;  %1032 = vrot.lane.b32.xlu1 %v990_v33, %s1680_s30 }
 0x3b8   : > { %1021 = vst.msk [vmem:[#allocation2 + $0x10] sm:$0xff] %vm713_vm6, %v1017_v34  ;;  %v1016_v36 = vmul.f32 %v1835_v7, %v1012_v35 }
 0x3b9   : > { %v1471_v37 = vpop.f32.mrf.mxu1 }
 0x3ba   : > { %1020 = vst.msk [vmem:[#allocation2 + $0x8] sm:$0xff] %vm713_vm6, %v1016_v36  ;;  %v1005_v39 = vadd.f32 %v1471_v37, %v1409_v26 }
 0x3bb   : > { %v999_v40 = vpop.f32.mrf.mxu1 }
 0x3bc   : > { %v1015_v42 = vadd.f32 %v1011_v38, %v1005_v39  ;;  %v1000_v43 = vadd.f32 %v1409_v26, %v999_v40  ;;  %1038 = vrot.lane.b32.xlu0 %v1005_v39, %s1680_s30 }
 0x3be   : > { %v1019_v44 = vmul.f32 %v1844_v10, %v1015_v42  ;;  %v1014_v45 = vadd.f32 %v1010_v41, %v1000_v43  ;;  %1036 = vrot.lane.b32.xlu1 %v1000_v43, %s1680_s30  ;;  %s1682_s30 = smov (!%p1414_p9), 120  }
 0x3c0   : > { %1023 = vst.msk [vmem:[#allocation2 + $0x20] sm:$0xff] %vm713_vm6, %v1019_v44  ;;  %v1018_v46 = vmul.f32 %v1841_v9, %v1014_v45 }
 0x3c2   : > { %1022 = vst.msk [vmem:[#allocation2 + $0x18] sm:$0xff] %vm713_vm6, %v1018_v46 }
 0x426   : > { %v1035_v48 = vpop.permute.xlu0 %1034 }
 0x427   : > { %v1045_v50 = vadd.f32 %v1035_v48, %v1025_v47 }
 0x428   : > { %v1033_v51 = vpop.permute.xlu1 %1032 }
 0x429   : > { %1049 = vst.msk [vmem:[#allocation3 + $0x8] sm:$0xff] %vm713_vm6, %v1045_v50  ;;  %v1044_v52 = vadd.f32 %v1033_v51, %v1024_v49 }
 0x42b   : > { %1048 = vst.msk [vmem:[#allocation3] sm:$0xff] %vm713_vm6, %v1044_v52 }
 0x42e   : > { %v1039_v54 = vpop.permute.xlu0 %1038 }
 0x42f   : > { %v1047_v56 = vadd.f32 %v1039_v54, %v1027_v53  ;;  %1055 = sbr.rel (%p1414_p9) target bundleno = 1429 (0x595), region = 68 }
 0x430   : > { %v1037_v57 = vpop.permute.xlu1 %1036 }
 0x431   : > { %1051 = vst.msk [vmem:[#allocation3 + $0x18] sm:$0xff] %vm713_vm6, %v1047_v56  ;;  %v1046_v58 = vadd.f32 %v1037_v57, %v1026_v55 }
 0x433   : > { %1050 = vst.msk [vmem:[#allocation3 + $0x10] sm:$0xff] %vm713_vm6, %v1046_v58 }
 0x434   : > { %v1067_v59 = vld [vmem:[%s2085_s11 + $0x18] sm:$0xff]  ;;  %v1066_v60 = vld [vmem:[%s2085_s11 + $0x10] sm:$0xff]  ;;  %v1065_v61 = vld [vmem:[%s2085_s11 + $0x8] sm:$0xff]  ;;  %vm1232_vm9 = vcmask 64512   ;;  %vm1237_vm10 = vcmask 195584  }
 0x435   : > { %1472 = vmatprep.subr.mxu0 %v1067_v59  ;;  %1490 = vmatprep.subr.mxu1 %v1067_v59  ;;  %v1056_v62 = vld [vmem:[#allocation3] sm:$0xff]  ;;  %v1057_v0 = vld [vmem:[#allocation3 + $0x8] sm:$0xff]  ;;  %v1064_v2 = vld [vmem:[%s2085_s11] sm:$0xff] }
 0x436   : > { %1473 = vmatpush3.msra.mxu0 %v1067_v59  ;;  %1494 = vmatpush3.msra.mxu1 %v1067_v59  ;;  %v1060_v3 = vmul.f32 %v1835_v7, %v1056_v62  ;;  %v1061_v5 = vmul.f32 %v1838_v8, %v1057_v0  ;;  %v1415_v12 = vld [vmem:[%s2086_s12] ss:$0 sm:$0xff]  ;;  %v1177_v32 = vld [vmem:[%s1807_s1 + $0x8] sm:$0xff]  ;;  %v1179_v34 = vld [vmem:[%s1807_s1 + $0x18] sm:$0xff] }
 0x437   : > { %1474 = vmatprep.subr.mxu0 %v1066_v60  ;;  %1491 = vmatprep.subr.mxu1 %v1066_v60  ;;  %v1176_v37 = vld [vmem:[%s1807_s1] sm:$0xff]  ;;  %v1178_v38 = vld [vmem:[%s1807_s1 + $0x10] sm:$0xff] }
 0x438   : > { %v1059_v1 = vld [vmem:[#allocation3 + $0x18] sm:$0xff]  ;;  %1475 = vmatpush3.msra.mxu0 %v1066_v60  ;;  %1495 = vmatpush3.msra.mxu1 %v1066_v60 }
 0x439   : > { %1476 = vmatprep.subr.mxu0 %v1065_v61  ;;  %1492 = vmatprep.subr.mxu1 %v1065_v61  ;;  %v1063_v11 = vmul.f32 %v1844_v10, %v1059_v1 }
 0x43a   : > { %v1058_v63 = vld [vmem:[#allocation3 + $0x10] sm:$0xff]  ;;  %1477 = vmatpush3.msra.mxu0 %v1065_v61  ;;  %1496 = vmatpush3.msra.mxu1 %v1065_v61 }
 0x43b   : > { %v1062_v4 = vmul.f32 %v1841_v9, %v1058_v63  ;;  %1478 = vmatprep.subr.mxu0 %v1064_v2  ;;  %1493 = vmatprep.subr.mxu1 %v1064_v2 }
 0x43c   : > { %1479 = vmatpush3.msra.mxu0 %v1064_v2  ;;  %1497 = vmatpush3.msra.mxu1 %v1064_v2 }
 0x43d   : > { %1480 = vmatprep.mubr.msk.f32.mxu0 %vm713_vm6, %v1060_v3  ;;  %1483 = vmatprep.mubr.msk.f32.mxu1 %vm713_vm6, %v1062_v4 }
 0x43e   : > { %1481 = vmatmul.mubr.msk.f32.vlgmr.msra.gmra.mxu0 %vm713_vm6, %v1061_v5  ;;  %1484 = vmatmul.mubr.msk.f32.vlgmr.msra.gmra.mxu1 %vm713_vm6, %v1063_v11 }
 0x4fe   : > { %v1482_v13 = vpop.f32.mrf.mxu0  ;;  %v1485_v14 = vpop.f32.mrf.mxu1 }
 0x4ff   : > { %v1159_v15 = vadd.f32 %v1482_v13, %v1415_v12  ;;  %v1169_v16 = vadd.f32 %v1485_v14, %v1415_v12 }
 0x500   : > { %v1153_v17 = vpop.f32.mrf.mxu0  ;;  %v1163_v18 = vpop.f32.mrf.mxu1 }
 0x501   : > { %v1173_v19 = vmul.f32 %v1838_v8, %v1159_v15  ;;  %v1175_v6 = vmul.f32 %v1844_v10, %v1169_v16  ;;  %v1154_v20 = vadd.f32 %v1415_v12, %v1153_v17  ;;  %v1164_v21 = vadd.f32 %v1415_v12, %v1163_v18 }
 0x503   : > { %v1182_v22 = vmul.f32 1.442695, %v1173_v19  ;;  %v1186_v23 = vmul.f32 1.442695, %v1175_v6  ;;  %v1172_v24 = vmul.f32 %v1835_v7, %v1154_v20  ;;  %v1174_v25 = vmul.f32 %v1841_v9, %v1164_v21 }
 0x505   : > { %1588 = vpow2.f32 %v1182_v22  ;;  %v1180_v26 = vmul.f32 1.442695, %v1172_v24  ;;  %v1184_v27 = vmul.f32 1.442695, %v1174_v25 }
 0x506   : > { %1590 = vpow2.f32 %v1186_v23 }
 0x507   : > { %1592 = vpow2.f32 %v1180_v26 }
 0x508   : > { %1594 = vpow2.f32 %v1184_v27 }
 0x512   : > { %v1589_v28 = vpop.eup %1588 }
 0x513   : > { %v1591_v29 = vpop.eup %1590  ;;  %1194 = vrot.lane.b32.xlu0 %v1589_v28, %s1682_s30 }
 0x514   : > { %1198 = vrot.lane.b32.xlu1 %v1591_v29, %s1682_s30  ;;  %v1593_v30 = vpop.eup %1592 }
 0x515   : > { %v1595_v31 = vpop.eup %1594 }
 0x517   : > { %1192 = vrot.lane.b32.xlu0 %v1593_v30, %s1682_s30 }
 0x518   : > { %1196 = vrot.lane.b32.xlu1 %v1595_v31, %s1682_s30 }
 0x51b   : > { %1220 = vrot.lane.b32.xlu0 %v1172_v24, %s1683_s16 }
 0x51c   : > { %1222 = vrot.lane.b32.xlu1 %v1173_v19, %s1683_s16 }
 0x51f   : > { %1224 = vrot.lane.b32.xlu0 %v1174_v25, %s1683_s16 }
 0x520   : > { %1226 = vrot.lane.b32.xlu1 %v1175_v6, %s1683_s16 }
 0x585   : > { %v1195_v33 = vpop.permute.xlu0 %1194 }
 0x586   : > { %v1199_v35 = vpop.permute.xlu1 %1198  ;;  %v1205_v36 = vmul.f32 %v1195_v33, %v1177_v32 }
 0x587   : > { %v1207_v39 = vmul.f32 %v1199_v35, %v1179_v34 }
 0x588   : > { %v1209_v40 = vadd.f32 %v1205_v36, %v1173_v19 }
 0x589   : > { %v1193_v41 = vpop.permute.xlu0 %1192  ;;  %v1211_v46 = vadd.f32 %v1207_v39, %v1175_v6 }
 0x58a   : > { %v1197_v42 = vpop.permute.xlu1 %1196  ;;  %v1204_v43 = vmul.f32 %v1193_v41, %v1176_v37  ;;  %v1213_v47 = vmul.f32 %v1838_v8, %v1209_v40 }
 0x58b   : > { %v1206_v44 = vmul.f32 %v1197_v42, %v1178_v38  ;;  %v1215_v55 = vmul.f32 %v1844_v10, %v1211_v46 }
 0x58c   : > { %v1208_v45 = vadd.f32 %v1204_v43, %v1172_v24 }
 0x58d   : > { %v1210_v48 = vadd.f32 %v1206_v44, %v1174_v25  ;;  %v1221_v49 = vpop.permute.xlu0 %1220 }
 0x58e   : > { %v1212_v50 = vmul.f32 %v1835_v7, %v1208_v45  ;;  %v1223_v51 = vpop.permute.xlu1 %1222 }
 0x58f   : > { %v1234_v52 = vsel %vm1232_vm9, %v1213_v47, %v1223_v51  ;;  %v1214_v53 = vmul.f32 %v1841_v9, %v1210_v48 }
 0x590   : > { %1239 = vst.msk [vmem:[%s1832_s25 + $0x8] sm:$0xff] %vm1237_vm10, %v1234_v52  ;;  %v1233_v54 = vsel %vm1232_vm9, %v1212_v50, %v1221_v49 }
 0x591   : > { %1238 = vst.msk [vmem:[%s1832_s25] sm:$0xff] %vm1237_vm10, %v1233_v54  ;;  %v1225_v56 = vpop.permute.xlu0 %1224 }
 0x592   : > { %v1227_v8 = vpop.permute.xlu1 %1226  ;;  %v1235_v57 = vsel %vm1232_vm9, %v1214_v53, %v1225_v56 }
 0x593   : > { %v1236_v58 = vsel %vm1232_vm9, %v1215_v55, %v1227_v8  ;;  %1240 = vst.msk [vmem:[%s1832_s25 + $0x10] sm:$0xff] %vm1237_vm10, %v1235_v57 }
 0x594   : > { %1241 = vst.msk [vmem:[%s1832_s25 + $0x18] sm:$0xff] %vm1237_vm10, %v1236_v58 }
 0x595 PF: > { %s37_s24 = sadd.s32 1, %s1672_s24   ;;  %s2098_s21 = sld [smem:[#allocation9_spill]] }
 0x596   : > { %p34_p10 = scmp.ge.s32.totalorder %s37_s24, 8   ;;  %s2099_s22 = sld [smem:[#allocation10_spill]] }
 0x597   : > { %s2100_s23 = sld [smem:[#allocation11_spill]] }
 0x598   : > { %s2101_s2 = sld [smem:[#allocation12_spill]]  ;;  %36 = sbr.rel (!%p34_p10) target bundleno = 39 (0x27), region = 118 }

</bundles_post_ra>
